<compile_context>
chip_gen: v5e
topology: v5e:2x2
jax: 0.10.0
libtpu: 0.0.40
codegen_flags: <defaults>
</compile_context>

<pallas_src>
import functools

import jax
import jax.numpy as jnp
from jax.experimental import pallas as pl
from jax.experimental.pallas import tpu as pltpu

NEG_SLOPE = 0.01  # PyTorch nn.LeakyReLU default
LANE = 128
_VMEM_LIMIT_BYTES = 48 << 20     # > v5e's 16 MiB scoped default, < v7x's 64 MiB physical
_STREAM_BUDGET_BYTES = 32 << 20  # budget for per-tile streamed blocks + live activations


def _leaky_relu(x):
    # max(x, a*x) == LeakyReLU(x) for 0 < a < 1  (2 VPU ops, no select).
    return jnp.maximum(x, NEG_SLOPE * x)


def _round_up(x, m):
    return ((x + m - 1) // m) * m


# --------------------------------------------------------------------------
# Kernel
# --------------------------------------------------------------------------
def dti_mlp_kernel(bond_ref, m_ref, w1e_ref, w1m_ref, b1_ref,
                   w2_ref, b2_ref, w3_ref, b3_ref, o_ref):
    # Layer 1: split-W1 sum-of-dots replaces concat([e, m]) @ W1.
    h = (jnp.dot(bond_ref[...], w1e_ref[...], preferred_element_type=jnp.float32)
         + jnp.dot(m_ref[...], w1m_ref[...], preferred_element_type=jnp.float32)
         + b1_ref[...])
    h = _leaky_relu(h)
    # Layers 2/3: cast activations to the compute dtype (bf16 by default) for
    # the MXU, accumulate in f32, bias-add / LeakyReLU in f32.
    h = jnp.dot(h.astype(w2_ref.dtype), w2_ref[...],
                preferred_element_type=jnp.float32) + b2_ref[...]
    h = _leaky_relu(h)
    h = jnp.dot(h.astype(w3_ref.dtype), w3_ref[...],
                preferred_element_type=jnp.float32) + b3_ref[...]
    h = _leaky_relu(h)
    o_ref[...] = h.astype(o_ref.dtype)


# --------------------------------------------------------------------------
# One-time parameter preparation (hoisted out of the per-forward path)
# --------------------------------------------------------------------------
def prepare_params(params, edge_dim, node_dim, compute_dtype=jnp.bfloat16):
    """Split W1 (kills the concat) and zero-pad hidden/output dims to 128 lanes.

    Zero padding is exact: padded columns get 0 pre-activation and
    LeakyReLU(0) == 0, so they contribute nothing downstream and the padded
    output columns are sliced off in the wrapper.
    """
    w1, b1 = params["w1"], params["b1"]
    w2, b2 = params["w2"], params["b2"]
    w3, b3 = params["w3"], params["b3"]
    hid = w2.shape[0]
    out_dim = w3.shape[1]
    H = _round_up(hid, LANE)
    O = _round_up(out_dim, LANE)
    pad_h = lambda a: jnp.pad(a, ((0, 0), (0, H - hid)))

    return {
        "w1e": pad_h(w1[:edge_dim]).astype(compute_dtype),                   # [edge_dim, H]
        "w1m": pad_h(w1[edge_dim:edge_dim + node_dim]).astype(compute_dtype),  # [node_dim, H]
        "b1": pad_h(b1).astype(jnp.float32),                                  # [1, H]
        "w2": jnp.pad(w2, ((0, H - hid), (0, H - hid))).astype(compute_dtype),  # [H, H]
        "b2": pad_h(b2).astype(jnp.float32),                                  # [1, H]
        "w3": jnp.pad(w3, ((0, H - hid), (0, O - out_dim))).astype(compute_dtype),  # [H, O]
        "b3": jnp.pad(b3, ((0, 0), (0, O - out_dim))).astype(jnp.float32),    # [1, O]
    }


# --------------------------------------------------------------------------
# Edge-axis tiling (VMEM-budgeted, >=2 even grid steps for large E on v7x)
# --------------------------------------------------------------------------
def _choose_edge_tiling(E, tile_e_max, per_row_bytes):
    tile_cap = max(8, (_STREAM_BUDGET_BYTES // per_row_bytes) // 8 * 8)
    tile_e_max = max(8, min(tile_e_max, tile_cap))
    n_tiles = pl.cdiv(E, tile_e_max)
    # The "parallel" edge axis shards across the 2 TensorCores on v7x; make
    # sure non-trivial problems present >= 2 (and an even number of) steps.
    if E >= 1024:
        n_tiles = max(n_tiles, 2)
    if n_tiles > 1 and n_tiles % 2 == 1:
        n_tiles += 1
    tile_e = _round_up(pl.cdiv(E, n_tiles), 8)
    return tile_e, n_tiles, n_tiles * tile_e


# --------------------------------------------------------------------------
# Forward
# --------------------------------------------------------------------------
@functools.partial(jax.jit, static_argnames=("out_dim", "tile_e"))
def dti_conv_graph3(atom_feats, bond_feats, src, dst, prepared, *,
                    out_dim, tile_e=4096):
    """Pallas implementation of DTIConvGraph3.forward.

    atom_feats: [N, node_dim] float32
    bond_feats: [E, edge_dim] float32
    src, dst:   [E] int32 edge endpoints
    prepared:   output of prepare_params (padded / split / cast weights)
    returns:    [E, out_dim] float32
    """
    # --- glue: u_add_v message (XLA gather; tiny relative to the MLP) ---
    m = atom_feats[src] + atom_feats[dst]                 # [E, node_dim] f32

    E, edge_dim = bond_feats.shape
    node_dim = atom_feats.shape[1]
    cdt = prepared["w2"].dtype
    H = prepared["w2"].shape[1]
    O = prepared["w3"].shape[1]
    in_bytes = jnp.dtype(cdt).itemsize

    bond = bond_feats.astype(cdt)
    m = m.astype(cdt)

    # VMEM per edge-row: double-buffered inputs + double-buffered f32 output
    # block (lane-padded to O) + live [tile, H] f32 activations.
    per_row_bytes = (2 * (edge_dim + node_dim) * in_bytes
                     + 2 * O * 4
                     + 2 * H * 4)
    tile_e_eff, n_tiles, E_pad = _choose_edge_tiling(E, tile_e, per_row_bytes)

    if E_pad != E:
        bond = jnp.pad(bond, ((0, E_pad - E), (0, 0)))
        m = jnp.pad(m, ((0, E_pad - E), (0, 0)))

    full2d = lambda a: pl.BlockSpec(a.shape, lambda i: (0, 0))

    flops = 2 * E_pad * ((edge_dim + node_dim) * H + H * H + H * O)
    bytes_accessed = (E_pad * (edge_dim + node_dim) * in_bytes      # inputs
                      + E_pad * O * 4                               # output
                      + ((edge_dim + node_dim) * H + H * H + H * O) * in_bytes
                      + (2 * H + O) * 4)                            # biases

    out = pl.pallas_call(
        dti_mlp_kernel,
        out_shape=jax.ShapeDtypeStruct((E_pad, O), jnp.float32),
        grid_spec=pltpu.PrefetchScalarGridSpec(
            num_scalar_prefetch=0,
            grid=(n_tiles,),
            in_specs=[
                pl.BlockSpec((tile_e_eff, edge_dim), lambda i: (i, 0)),
                pl.BlockSpec((tile_e_eff, node_dim), lambda i: (i, 0)),
                full2d(prepared["w1e"]), full2d(prepared["w1m"]), full2d(prepared["b1"]),
                full2d(prepared["w2"]), full2d(prepared["b2"]),
                full2d(prepared["w3"]), full2d(prepared["b3"]),
            ],
            out_specs=pl.BlockSpec((tile_e_eff, O), lambda i: (i, 0)),
        ),
        compiler_params=pltpu.CompilerParams(
            dimension_semantics=("parallel",),
            vmem_limit_bytes=_VMEM_LIMIT_BYTES),
        cost_estimate=pl.CostEstimate(
            flops=int(flops), transcendentals=0,
            bytes_accessed=int(bytes_accessed)),
    )(bond, m, prepared["w1e"], prepared["w1m"], prepared["b1"],
      prepared["w2"], prepared["b2"], prepared["w3"], prepared["b3"])

    return out[:E, :out_dim]


# --------------------------------------------------------------------------
# Synthetic init + pure-JAX reference + demo
# --------------------------------------------------------------------------
def init_params(key, in_dim, out_dim):
    """Deterministic synthetic init (uniform, roughly PyTorch Linear scale)."""
    ks = jax.random.split(key, 6)

    def lin(kw, kb, fan_in, fan_out):
        bound = 1.0 / jnp.sqrt(fan_in)
        w = jax.random.uniform(kw, (fan_in, fan_out), jnp.float32, -bound, bound)
        b = jax.random.uniform(kb, (1, fan_out), jnp.float32, -bound, bound)
        return w, b

    w1, b1 = lin(ks[0], ks[1], in_dim, out_dim)
    w2, b2 = lin(ks[2], ks[3], out_dim, out_dim)
    w3, b3 = lin(ks[4], ks[5], out_dim, out_dim)
    return {"w1": w1, "b1": b1, "w2": w2, "b2": b2, "w3": w3, "b3": b3}


def reference(atom_feats, bond_feats, src, dst, p):
    m = atom_feats[src] + atom_feats[dst]
    x = jnp.concatenate([bond_feats, m], axis=1)
    lrelu = lambda v: jnp.where(v > 0, v, NEG_SLOPE * v)
    h = lrelu(x @ p["w1"] + p["b1"])
    h = lrelu(h @ p["w2"] + p["b2"])
    h = lrelu(h @ p["w3"] + p["b3"])
    return h


if __name__ == "__main__":
    key = jax.random.PRNGKey(0)
    k_h, k_e, k_src, k_dst, k_p = jax.random.split(key, 5)

    N, E = 16, 64            # nodes, edges (small demo shapes)
    node_dim, edge_dim = 8, 8
    in_dim = node_dim + edge_dim   # concat([e, m]) feature width
    out_dim = 32

    atom_feats = jax.random.normal(k_h, (N, node_dim), jnp.float32)
    bond_feats = jax.random.normal(k_e, (E, edge_dim), jnp.float32)
    src = jax.random.randint(k_src, (E,), 0, N, jnp.int32)
    dst = jax.random.randint(k_dst, (E,), 0, N, jnp.int32)

    params = init_params(k_p, in_dim, out_dim)
    ref = reference(atom_feats, bond_feats, src, dst, params)

    # f32 compute path: exact against the reference.
    prep_f32 = prepare_params(params, edge_dim, node_dim, jnp.float32)
    out_f32 = jax.block_until_ready(
        dti_conv_graph3(atom_feats, bond_feats, src, dst, prep_f32,
                        out_dim=out_dim))
    assert out_f32.shape == (E, out_dim)
    err_f32 = float(jnp.max(jnp.abs(out_f32 - ref)))
    assert jnp.allclose(out_f32, ref, atol=1e-4, rtol=1e-4), err_f32

    # bf16-operand MXU path (f32 accumulate) — the default for v6e/v7x.
    prep_bf16 = prepare_params(params, edge_dim, node_dim, jnp.bfloat16)
    out_bf16 = jax.block_until_ready(
        dti_conv_graph3(atom_feats, bond_feats, src, dst, prep_bf16,
                        out_dim=out_dim))
    assert out_bf16.shape == (E, out_dim)
    err_bf16 = float(jnp.max(jnp.abs(out_bf16 - ref)))
    assert jnp.allclose(out_bf16, ref, atol=3e-2, rtol=3e-2), err_bf16

    print("KERNEL_OK")
</pallas_src>

<mosaic_0001>
module attributes {stable_mosaic.version = 11 : i64} {
  func.func @dti_mlp_kernel(%arg0: i32, %arg1: memref<64x8xf32, #tpu.memory_space<vmem>>, %arg2: memref<64x8xf32, #tpu.memory_space<vmem>>, %arg3: memref<8x128xf32, #tpu.memory_space<vmem>>, %arg4: memref<8x128xf32, #tpu.memory_space<vmem>>, %arg5: memref<1x128xf32, #tpu.memory_space<vmem>>, %arg6: memref<128x128xf32, #tpu.memory_space<vmem>>, %arg7: memref<1x128xf32, #tpu.memory_space<vmem>>, %arg8: memref<128x128xf32, #tpu.memory_space<vmem>>, %arg9: memref<1x128xf32, #tpu.memory_space<vmem>>, %arg10: memref<64x128xf32, #tpu.memory_space<vmem>>) attributes {dimension_semantics = [#tpu.dimension_semantics<parallel>], iteration_bounds = array<i64: 1>, scalar_prefetch = 0 : i64, scratch_operands = 0 : i64, tpu.core_type = #tpu.core_type<tc>, window_params = [{transform_indices = @transform_0, window_bounds = array<i64: 64, 8>}, {transform_indices = @transform_1, window_bounds = array<i64: 64, 8>}, {pipeline_mode = #tpu.pipeline_mode<synchronous>, transform_indices = @transform_2, window_bounds = array<i64: 8, 128>}, {pipeline_mode = #tpu.pipeline_mode<synchronous>, transform_indices = @transform_3, window_bounds = array<i64: 8, 128>}, {pipeline_mode = #tpu.pipeline_mode<synchronous>, transform_indices = @transform_4, window_bounds = array<i64: 1, 128>}, {pipeline_mode = #tpu.pipeline_mode<synchronous>, transform_indices = @transform_5, window_bounds = array<i64: 128, 128>}, {pipeline_mode = #tpu.pipeline_mode<synchronous>, transform_indices = @transform_6, window_bounds = array<i64: 1, 128>}, {pipeline_mode = #tpu.pipeline_mode<synchronous>, transform_indices = @transform_7, window_bounds = array<i64: 128, 128>}, {pipeline_mode = #tpu.pipeline_mode<synchronous>, transform_indices = @transform_8, window_bounds = array<i64: 1, 128>}, {transform_indices = @transform_9, window_bounds = array<i64: 64, 128>}]} {
    %c0 = arith.constant 0 : index
    %c0_0 = arith.constant 0 : index
    %0 = vector.load %arg1[%c0, %c0_0] : memref<64x8xf32, #tpu.memory_space<vmem>>, vector<64x8xf32>
    %c0_1 = arith.constant 0 : index
    %c0_2 = arith.constant 0 : index
    %1 = vector.load %arg3[%c0_1, %c0_2] : memref<8x128xf32, #tpu.memory_space<vmem>>, vector<8x128xf32>
    %cst = arith.constant dense<0.000000e+00> : vector<64x128xf32>
    %2 = tpu.matmul %0, %1, %cst {dimension_numbers = #tpu.dot_dimension_numbers<[1], [0], [0], [1], [0, 0, 1, 1], [], []>} : vector<64x8xf32>, vector<8x128xf32>, vector<64x128xf32> -> vector<64x128xf32>
    %c0_3 = arith.constant 0 : index
    %c0_4 = arith.constant 0 : index
    %3 = vector.load %arg2[%c0_3, %c0_4] : memref<64x8xf32, #tpu.memory_space<vmem>>, vector<64x8xf32>
    %c0_5 = arith.constant 0 : index
    %c0_6 = arith.constant 0 : index
    %4 = vector.load %arg4[%c0_5, %c0_6] : memref<8x128xf32, #tpu.memory_space<vmem>>, vector<8x128xf32>
    %cst_7 = arith.constant dense<0.000000e+00> : vector<64x128xf32>
    %5 = tpu.matmul %3, %4, %cst_7 {dimension_numbers = #tpu.dot_dimension_numbers<[1], [0], [0], [1], [0, 0, 1, 1], [], []>} : vector<64x8xf32>, vector<8x128xf32>, vector<64x128xf32> -> vector<64x128xf32>
    %6 = arith.addf %2, %5 : vector<64x128xf32>
    %c0_8 = arith.constant 0 : index
    %c0_9 = arith.constant 0 : index
    %7 = vector.load %arg5[%c0_8, %c0_9] : memref<1x128xf32, #tpu.memory_space<vmem>>, vector<1x128xf32>
    %8 = vector.broadcast %7 : vector<1x128xf32> to vector<64x128xf32>
    %9 = arith.addf %6, %8 : vector<64x128xf32>
    %cst_10 = arith.constant 0.00999999977 : f32
    %10 = vector.broadcast %cst_10 : f32 to vector<64x128xf32>
    %11 = arith.mulf %10, %9 : vector<64x128xf32>
    %12 = arith.maximumf %9, %11 : vector<64x128xf32>
    %c0_11 = arith.constant 0 : index
    %c0_12 = arith.constant 0 : index
    %13 = vector.load %arg6[%c0_11, %c0_12] : memref<128x128xf32, #tpu.memory_space<vmem>>, vector<128x128xf32>
    %cst_13 = arith.constant dense<0.000000e+00> : vector<64x128xf32>
    %14 = tpu.matmul %12, %13, %cst_13 {dimension_numbers = #tpu.dot_dimension_numbers<[1], [0], [0], [1], [0, 0, 1, 1], [], []>} : vector<64x128xf32>, vector<128x128xf32>, vector<64x128xf32> -> vector<64x128xf32>
    %c0_14 = arith.constant 0 : index
    %c0_15 = arith.constant 0 : index
    %15 = vector.load %arg7[%c0_14, %c0_15] : memref<1x128xf32, #tpu.memory_space<vmem>>, vector<1x128xf32>
    %16 = vector.broadcast %15 : vector<1x128xf32> to vector<64x128xf32>
    %17 = arith.addf %14, %16 : vector<64x128xf32>
    %cst_16 = arith.constant 0.00999999977 : f32
    %18 = vector.broadcast %cst_16 : f32 to vector<64x128xf32>
    %19 = arith.mulf %18, %17 : vector<64x128xf32>
    %20 = arith.maximumf %17, %19 : vector<64x128xf32>
    %c0_17 = arith.constant 0 : index
    %c0_18 = arith.constant 0 : index
    %21 = vector.load %arg8[%c0_17, %c0_18] : memref<128x128xf32, #tpu.memory_space<vmem>>, vector<128x128xf32>
    %cst_19 = arith.constant dense<0.000000e+00> : vector<64x128xf32>
    %22 = tpu.matmul %20, %21, %cst_19 {dimension_numbers = #tpu.dot_dimension_numbers<[1], [0], [0], [1], [0, 0, 1, 1], [], []>} : vector<64x128xf32>, vector<128x128xf32>, vector<64x128xf32> -> vector<64x128xf32>
    %c0_20 = arith.constant 0 : index
    %c0_21 = arith.constant 0 : index
    %23 = vector.load %arg9[%c0_20, %c0_21] : memref<1x128xf32, #tpu.memory_space<vmem>>, vector<1x128xf32>
    %24 = vector.broadcast %23 : vector<1x128xf32> to vector<64x128xf32>
    %25 = arith.addf %22, %24 : vector<64x128xf32>
    %cst_22 = arith.constant 0.00999999977 : f32
    %26 = vector.broadcast %cst_22 : f32 to vector<64x128xf32>
    %27 = arith.mulf %26, %25 : vector<64x128xf32>
    %28 = arith.maximumf %25, %27 : vector<64x128xf32>
    %c0_23 = arith.constant 0 : index
    %c0_24 = arith.constant 0 : index
    %29 = vector.load %arg10[%c0_23, %c0_24] : memref<64x128xf32, #tpu.memory_space<vmem>>, vector<64x128xf32>
    tpu.vector_store %arg10[%c0_23, %c0_24], %28 {strides = array<i32>} : memref<64x128xf32, #tpu.memory_space<vmem>>, vector<64x128xf32>,
    return
  }
  func.func @transform_0(%arg0: i32) -> (i32, i32) {
    %c0_i32 = arith.constant 0 : i32
    %c0_i32_0 = arith.constant 0 : i32
    return %arg0, %c0_i32 : i32, i32
  }
  func.func @transform_1(%arg0: i32) -> (i32, i32) {
    %c0_i32 = arith.constant 0 : i32
    %c0_i32_0 = arith.constant 0 : i32
    return %arg0, %c0_i32 : i32, i32
  }
  func.func @transform_2(%arg0: i32) -> (i32, i32) {
    %c0_i32 = arith.constant 0 : i32
    %c0_i32_0 = arith.constant 0 : i32
    %c0_i32_1 = arith.constant 0 : i32
    return %c0_i32, %c0_i32_0 : i32, i32
  }
  func.func @transform_3(%arg0: i32) -> (i32, i32) {
    %c0_i32 = arith.constant 0 : i32
    %c0_i32_0 = arith.constant 0 : i32
    %c0_i32_1 = arith.constant 0 : i32
    return %c0_i32, %c0_i32_0 : i32, i32
  }
  func.func @transform_4(%arg0: i32) -> (i32, i32) {
    %c0_i32 = arith.constant 0 : i32
    %c0_i32_0 = arith.constant 0 : i32
    %c0_i32_1 = arith.constant 0 : i32
    return %c0_i32, %c0_i32_0 : i32, i32
  }
  func.func @transform_5(%arg0: i32) -> (i32, i32) {
    %c0_i32 = arith.constant 0 : i32
    %c0_i32_0 = arith.constant 0 : i32
    %c0_i32_1 = arith.constant 0 : i32
    return %c0_i32, %c0_i32_0 : i32, i32
  }
  func.func @transform_6(%arg0: i32) -> (i32, i32) {
    %c0_i32 = arith.constant 0 : i32
    %c0_i32_0 = arith.constant 0 : i32
    %c0_i32_1 = arith.constant 0 : i32
    return %c0_i32, %c0_i32_0 : i32, i32
  }
  func.func @transform_7(%arg0: i32) -> (i32, i32) {
    %c0_i32 = arith.constant 0 : i32
    %c0_i32_0 = arith.constant 0 : i32
    %c0_i32_1 = arith.constant 0 : i32
    return %c0_i32, %c0_i32_0 : i32, i32
  }
  func.func @transform_8(%arg0: i32) -> (i32, i32) {
    %c0_i32 = arith.constant 0 : i32
    %c0_i32_0 = arith.constant 0 : i32
    %c0_i32_1 = arith.constant 0 : i32
    return %c0_i32, %c0_i32_0 : i32, i32
  }
  func.func @transform_9(%arg0: i32) -> (i32, i32) {
    %c0_i32 = arith.constant 0 : i32
    %c0_i32_0 = arith.constant 0 : i32
    return %arg0, %c0_i32 : i32, i32
  }
}

</mosaic_0001>

<bundles_post_ra>
// kernel: dti_conv_graph3.1
= control target key start
LH: loop header
LB: loop body
LE: loop exit
PB: predicated region body
PF: predicated region fallthrough
CT: control target
= control target key end

     0   :  { %vm50_vm0 = vcmask 64512   ;;  %s685_s3 = inlined_call_operand.vmem [shape: f32[8,128], index: 3, kind: input, shape index: {}]   ;;  %s686_s2 = inlined_call_operand.vmem [shape: f32[8,128], index: 2, kind: input, shape index: {}]   ;;  %s687_s1 = inlined_call_operand.vmem [shape: f32[64,8], index: 1, kind: input, shape index: {}]   ;;  %s688_s0 = inlined_call_operand.vmem [shape: f32[64,8], index: 0, kind: input, shape index: {}]   ;;  %s689_s4 = inlined_call_operand.vmem [shape: f32[1,128], index: 4, kind: input, shape index: {}]   ;;  %s690_s5 = inlined_call_operand.vmem [shape: f32[128,128], index: 5, kind: input, shape index: {}]   ;;  %s691_s6 = inlined_call_operand.vmem [shape: f32[1,128], index: 6, kind: input, shape index: {}]   ;;  %s692_s7 = inlined_call_operand.vmem [shape: f32[128,128], index: 7, kind: input, shape index: {}]   ;;  %s693_s8 = inlined_call_operand.vmem [shape: f32[1,128], index: 8, kind: input, shape index: {}]   ;;  %s694_s9 = inlined_call_operand.vmem [shape: f32[64,128], index: 9, kind: output, shape index: {}]  }
   0x1   :  { %v49_v0 = vld [vmem:[%s685_s3] sm:$0xff]  ;;  %v42_v4 = vld [vmem:[%s687_s1 + $0x8] sm:$0xff]  ;;  %v43_v6 = vld [vmem:[%s687_s1 + $0x10] sm:$0xff] }
   0x2   :  { %v40_v1 = vld [vmem:[%s686_s2] sm:$0xff]  ;;  %90 = vmatpush.msra.mxu0 %v49_v0  ;;  %v33_v5 = vld [vmem:[%s688_s0 + $0x8] sm:$0xff]  ;;  %v34_v7 = vld [vmem:[%s688_s0 + $0x10] sm:$0xff] }
   0x3   :  { %v41_v2 = vld [vmem:[%s687_s1] sm:$0xff]  ;;  %155 = vmatpush.msra.mxu1 %v40_v1  ;;  %v44_v8 = vld [vmem:[%s687_s1 + $0x18] sm:$0xff]  ;;  %v223_v11 = vld [vmem:[%s690_s5 + $0x70] sm:$0xff] }
   0x4   :  { %v32_v3 = vld [vmem:[%s688_s0] sm:$0xff]  ;;  %375 = vmatmul.msk.f32.vlgmr.msra.gmra.mxu0 %vm50_vm0, %v41_v2  ;;  %v35_v9 = vld [vmem:[%s688_s0 + $0x18] sm:$0xff]  ;;  %v222_v12 = vld [vmem:[%s690_s5 + $0x68] sm:$0xff] }
   0x5   :  { %383 = vmatmul.msk.f32.vlgmr.msra.gmra.mxu1 %vm50_vm0, %v32_v3  ;;  %v224_v10 = vld [vmem:[%s690_s5 + $0x78] sm:$0xff]  ;;  %v221_v13 = vld [vmem:[%s690_s5 + $0x60] sm:$0xff]  ;;  %v219_v17 = vld [vmem:[%s690_s5 + $0x50] sm:$0xff] }
   0x6   :  { %229 = vmatpush.msrb.mxu0 %v224_v10  ;;  %391 = vmatpush.msra.mxu2 %v224_v10  ;;  %v45_v14 = vld [vmem:[%s687_s1 + $0x20] sm:$0xff]  ;;  %v220_v16 = vld [vmem:[%s690_s5 + $0x58] sm:$0xff]  ;;  %v218_v18 = vld [vmem:[%s690_s5 + $0x48] sm:$0xff] }
   0x7   :  { %v36_v15 = vld [vmem:[%s688_s0 + $0x20] sm:$0xff]  ;;  %v46_v20 = vld [vmem:[%s687_s1 + $0x28] sm:$0xff]  ;;  %v216_v22 = vld [vmem:[%s690_s5 + $0x38] sm:$0xff] }
   0x8   :  { %230 = vmatpush.msrb.mxu0 %v223_v11  ;;  %392 = vmatpush.msra.mxu2 %v223_v11  ;;  %v217_v19 = vld [vmem:[%s690_s5 + $0x40] sm:$0xff]  ;;  %v37_v21 = vld [vmem:[%s688_s0 + $0x28] sm:$0xff]  ;;  %v215_v23 = vld [vmem:[%s690_s5 + $0x30] sm:$0xff] }
   0x9   :  { %v214_v24 = vld [vmem:[%s690_s5 + $0x28] sm:$0xff]  ;;  %v47_v25 = vld [vmem:[%s687_s1 + $0x30] sm:$0xff]  ;;  %v48_v27 = vld [vmem:[%s687_s1 + $0x38] sm:$0xff] }
   0xa   :  { %231 = vmatpush.msrb.mxu0 %v222_v12  ;;  %393 = vmatpush.msra.mxu2 %v222_v12  ;;  %v38_v26 = vld [vmem:[%s688_s0 + $0x30] sm:$0xff]  ;;  %v39_v28 = vld [vmem:[%s688_s0 + $0x38] sm:$0xff]  ;;  %v213_v29 = vld [vmem:[%s690_s5 + $0x20] sm:$0xff] }
   0xb   :  { %v212_v30 = vld [vmem:[%s690_s5 + $0x18] sm:$0xff]  ;;  %v211_v31 = vld [vmem:[%s690_s5 + $0x10] sm:$0xff]  ;;  %v210_v32 = vld [vmem:[%s690_s5 + $0x8] sm:$0xff] }
   0xc   :  { %376 = vmatmul.msk.f32.gmra.mxu0 %vm50_vm0, %v42_v4  ;;  %394 = vmatpush.msra.mxu2 %v221_v13  ;;  %v209_v33 = vld [vmem:[%s690_s5] sm:$0xff]  ;;  %v301_v62 = vld [vmem:[%s692_s7 + $0x78] sm:$0xff]  ;;  %v300_v63 = vld [vmem:[%s692_s7 + $0x70] sm:$0xff] }
   0xd   :  { %384 = vmatmul.msk.f32.gmra.mxu1 %vm50_vm0, %v33_v5  ;;  %232 = vmatpush.msrb.mxu0 %v221_v13  ;;  %v597_v34 = vld [vmem:[%s689_s4] ss:$0 sm:$0xff]  ;;  %v299_v1 = vld [vmem:[%s692_s7 + $0x68] sm:$0xff]  ;;  %v297_v5 = vld [vmem:[%s692_s7 + $0x58] sm:$0xff] }
   0xe   :  { %395 = vmatpush.msra.mxu2 %v220_v16  ;;  %306 = vmatpush.msrb.mxu1 %v301_v62  ;;  %v298_v3 = vld [vmem:[%s692_s7 + $0x60] sm:$0xff]  ;;  %v295_v11 = vld [vmem:[%s692_s7 + $0x48] sm:$0xff] }
   0xf   :  { %233 = vmatpush.msrb.mxu0 %v220_v16  ;;  %407 = vmatpush.msra.mxu3 %v301_v62  ;;  %v294_v13 = vld [vmem:[%s692_s7 + $0x40] sm:$0xff] }
  0x10   :  { %396 = vmatpush.msra.mxu2 %v219_v17  ;;  %307 = vmatpush.msrb.mxu1 %v300_v63 }
  0x11   :  { %234 = vmatpush.msrb.mxu0 %v219_v17  ;;  %408 = vmatpush.msra.mxu3 %v300_v63 }
  0x12   :  { %397 = vmatpush.msra.mxu2 %v218_v18  ;;  %308 = vmatpush.msrb.mxu1 %v299_v1 }
  0x13   :  { %235 = vmatpush.msrb.mxu0 %v218_v18  ;;  %409 = vmatpush.msra.mxu3 %v299_v1 }
  0x14   :  { %377 = vmatmul.msk.f32.gmra.mxu0 %vm50_vm0, %v43_v6  ;;  %398 = vmatpush.msra.mxu2 %v217_v19 }
  0x15   :  { %385 = vmatmul.msk.f32.gmra.mxu1 %vm50_vm0, %v34_v7  ;;  %236 = vmatpush.msrb.mxu0 %v217_v19  ;;  %v292_v19 = vld [vmem:[%s692_s7 + $0x30] sm:$0xff] }
  0x16   :  { %399 = vmatpush.msra.mxu2 %v216_v22  ;;  %309 = vmatpush.msrb.mxu1 %v298_v3 }
  0x17   :  { %237 = vmatpush.msrb.mxu0 %v216_v22  ;;  %410 = vmatpush.msra.mxu3 %v298_v3 }
  0x18   :  { %400 = vmatpush.msra.mxu2 %v215_v23  ;;  %310 = vmatpush.msrb.mxu1 %v297_v5 }
  0x19   :  { %238 = vmatpush.msrb.mxu0 %v215_v23  ;;  %411 = vmatpush.msra.mxu3 %v297_v5  ;;  %v290_v23 = vld [vmem:[%s692_s7 + $0x20] sm:$0xff] }
  0x1a   :  { %401 = vmatpush.msra.mxu2 %v214_v24 }
  0x1b   :  { %239 = vmatpush.msrb.mxu0 %v214_v24 }
  0x1c   :  { %378 = vmatmul.msk.f32.gmra.mxu0 %vm50_vm0, %v44_v8  ;;  %402 = vmatpush.msra.mxu2 %v213_v29 }
  0x1d   :  { %386 = vmatmul.msk.f32.gmra.mxu1 %vm50_vm0, %v35_v9  ;;  %240 = vmatpush.msrb.mxu0 %v213_v29  ;;  %v296_v9 = vld [vmem:[%s692_s7 + $0x50] sm:$0xff] }
  0x1e   :  { %403 = vmatpush.msra.mxu2 %v212_v30  ;;  %311 = vmatpush.msrb.mxu1 %v296_v9 }
  0x1f   :  { %241 = vmatpush.msrb.mxu0 %v212_v30  ;;  %412 = vmatpush.msra.mxu3 %v296_v9 }
  0x20   :  { %404 = vmatpush.msra.mxu2 %v211_v31  ;;  %312 = vmatpush.msrb.mxu1 %v295_v11 }
  0x21   :  { %242 = vmatpush.msrb.mxu0 %v211_v31  ;;  %413 = vmatpush.msra.mxu3 %v295_v11  ;;  %v289_v31 = vld [vmem:[%s692_s7 + $0x18] sm:$0xff] }
  0x22   :  { %405 = vmatpush.msra.mxu2 %v210_v32  ;;  %313 = vmatpush.msrb.mxu1 %v294_v13 }
  0x23   :  { %243 = vmatpush.msrb.mxu0 %v210_v32  ;;  %414 = vmatpush.msra.mxu3 %v294_v13  ;;  %v288_v32 = vld [vmem:[%s692_s7 + $0x10] sm:$0xff] }
  0x24   :  { %379 = vmatmul.msk.f32.gmra.mxu0 %vm50_vm0, %v45_v14  ;;  %406 = vmatpush.msra.mxu2 %v209_v33 }
  0x25   :  { %387 = vmatmul.msk.f32.gmra.mxu1 %vm50_vm0, %v36_v15  ;;  %244 = vmatpush.msrb.mxu0 %v209_v33  ;;  %v293_v15 = vld [vmem:[%s692_s7 + $0x38] sm:$0xff]  ;;  %v287_v33 = vld [vmem:[%s692_s7 + $0x8] sm:$0xff] }
  0x26   :  { %314 = vmatpush.msrb.mxu1 %v293_v15  ;;  %415 = vmatpush.msra.mxu3 %v293_v15 }
  0x28   :  { %315 = vmatpush.msrb.mxu1 %v292_v19  ;;  %416 = vmatpush.msra.mxu3 %v292_v19 }
  0x2c   :  { %380 = vmatmul.msk.f32.gmra.mxu0 %vm50_vm0, %v46_v20 }
  0x2d   :  { %388 = vmatmul.msk.f32.gmra.mxu1 %vm50_vm0, %v37_v21  ;;  %v291_v21 = vld [vmem:[%s692_s7 + $0x28] sm:$0xff] }
  0x2e   :  { %316 = vmatpush.msrb.mxu1 %v291_v21  ;;  %417 = vmatpush.msra.mxu3 %v291_v21 }
  0x30   :  { %317 = vmatpush.msrb.mxu1 %v290_v23  ;;  %418 = vmatpush.msra.mxu3 %v290_v23 }
  0x32   :  { %318 = vmatpush.msrb.mxu1 %v289_v31  ;;  %419 = vmatpush.msra.mxu3 %v289_v31 }
  0x34   :  { %381 = vmatmul.msk.f32.gmra.mxu0 %vm50_vm0, %v47_v25  ;;  %319 = vmatpush.msrb.mxu1 %v288_v32 }
  0x35   :  { %389 = vmatmul.msk.f32.gmra.mxu1 %vm50_vm0, %v38_v26  ;;  %420 = vmatpush.msra.mxu3 %v288_v32 }
  0x36   :  { %320 = vmatpush.msrb.mxu1 %v287_v33 }
  0x37   :  { %421 = vmatpush.msra.mxu3 %v287_v33 }
  0x3c   :  { %382 = vmatmul.msk.f32.gmra.mxu0 %vm50_vm0, %v48_v27 }
  0x3d   :  { %390 = vmatmul.msk.f32.gmra.mxu1 %vm50_vm0, %v39_v28 }
  0x81   :  { %v92_v35 = vpop.f32.mrf.mxu0 }
  0x82   :  { %v157_v36 = vpop.f32.mrf.mxu1 }
  0x83   :  { %v158_v37 = vadd.f32 %v157_v36, %v92_v35  ;;  %v424_v35 = vld [vmem:[%s691_s6] ss:$0 sm:$0xff] }
  0x85   :  { %v185_v38 = vadd.f32 %v597_v34, %v158_v37 }
  0x87   :  { %v193_v39 = vmul.f32 0.01, %v185_v38 }
  0x89   :  { %v201_v40 = vmax.f32 %v185_v38, %v193_v39  ;;  %v95_v41 = vpop.f32.mrf.mxu0 }
  0x8a   :  { %v160_v42 = vpop.f32.mrf.mxu1 }
  0x8b   :  { %v161_v43 = vadd.f32 %v160_v42, %v95_v41  ;;  %245 = vmatmul.f32.vlgmr.msrb.gmra.mxu0 %v201_v40 }
  0x8d   :  { %v186_v44 = vadd.f32 %v597_v34, %v161_v43 }
  0x8f   :  { %v194_v45 = vmul.f32 0.01, %v186_v44 }
  0x91   :  { %v202_v46 = vmax.f32 %v186_v44, %v194_v45  ;;  %v98_v47 = vpop.f32.mrf.mxu0 }
  0x92   :  { %v163_v48 = vpop.f32.mrf.mxu1 }
  0x93   :  { %v164_v49 = vadd.f32 %v163_v48, %v98_v47  ;;  %248 = vmatmul.f32.vlgmr.msra.gmra.mxu2 %v202_v46 }
  0x95   :  { %v187_v50 = vadd.f32 %v597_v34, %v164_v49 }
  0x97   :  { %v195_v51 = vmul.f32 0.01, %v187_v50 }
  0x99   :  { %v203_v52 = vmax.f32 %v187_v50, %v195_v51  ;;  %v101_v53 = vpop.f32.mrf.mxu0 }
  0x9a   :  { %v166_v54 = vpop.f32.mrf.mxu1 }
  0x9b   :  { %v167_v55 = vadd.f32 %v166_v54, %v101_v53  ;;  %251 = vmatmul.f32.gmra.mxu2 %v203_v52 }
  0x9d   :  { %v188_v56 = vadd.f32 %v597_v34, %v167_v55 }
  0x9f   :  { %v196_v57 = vmul.f32 0.01, %v188_v56 }
  0xa1   :  { %v204_v58 = vmax.f32 %v188_v56, %v196_v57  ;;  %v104_v59 = vpop.f32.mrf.mxu0 }
  0xa2   :  { %v169_v60 = vpop.f32.mrf.mxu1 }
  0xa3   :  { %v170_v61 = vadd.f32 %v169_v60, %v104_v59  ;;  %254 = vmatmul.f32.gmra.mxu2 %v204_v58 }
  0xa5   :  { %v189_v0 = vadd.f32 %v597_v34, %v170_v61 }
  0xa7   :  { %v197_v2 = vmul.f32 0.01, %v189_v0 }
  0xa9   :  { %v205_v4 = vmax.f32 %v189_v0, %v197_v2  ;;  %v107_v6 = vpop.f32.mrf.mxu0 }
  0xaa   :  { %v172_v7 = vpop.f32.mrf.mxu1 }
  0xab   :  { %v173_v8 = vadd.f32 %v172_v7, %v107_v6  ;;  %257 = vmatmul.f32.gmra.mxu2 %v205_v4  ;;  %v425_v4 = vld [vmem:[%s693_s8] ss:$0 sm:$0xff] }
  0xad   :  { %v190_v10 = vadd.f32 %v597_v34, %v173_v8 }
  0xaf   :  { %v198_v12 = vmul.f32 0.01, %v190_v10 }
  0xb1   :  { %v206_v14 = vmax.f32 %v190_v10, %v198_v12  ;;  %v110_v16 = vpop.f32.mrf.mxu0 }
  0xb2   :  { %v175_v17 = vpop.f32.mrf.mxu1 }
  0xb3   :  { %v176_v18 = vadd.f32 %v175_v17, %v110_v16  ;;  %260 = vmatmul.f32.gmra.mxu2 %v206_v14 }
  0xb5   :  { %v191_v20 = vadd.f32 %v597_v34, %v176_v18 }
  0xb7   :  { %v199_v22 = vmul.f32 0.01, %v191_v20 }
  0xb9   :  { %v207_v24 = vmax.f32 %v191_v20, %v199_v22  ;;  %v113_v25 = vpop.f32.mrf.mxu0 }
  0xba   :  { %v178_v26 = vpop.f32.mrf.mxu1 }
  0xbb   :  { %v179_v27 = vadd.f32 %v178_v26, %v113_v25  ;;  %263 = vmatmul.f32.gmra.mxu2 %v207_v24 }
  0xbd   :  { %v192_v28 = vadd.f32 %v597_v34, %v179_v27  ;;  %v286_v34 = vld [vmem:[%s692_s7] sm:$0xff] }
  0xbe   :  { %321 = vmatpush.msrb.mxu1 %v286_v34  ;;  %422 = vmatpush.msra.mxu3 %v286_v34 }
  0xbf   :  { %v200_v29 = vmul.f32 0.01, %v192_v28 }
  0xc1   :  { %v208_v30 = vmax.f32 %v192_v28, %v200_v29 }
  0xc3   :  { %266 = vmatmul.f32.gmra.mxu2 %v208_v30 }
 0x108   :  { %v246_v36 = vpop.f32.mrf.mxu0 }
 0x109   :  { %v247_v37 = vadd.f32 %v424_v35, %v246_v36 }
 0x10b   :  { %v270_v38 = vmul.f32 0.01, %v247_v37 }
 0x10d   :  { %v278_v39 = vmax.f32 %v247_v37, %v270_v38 }
 0x10f   :  { %322 = vmatmul.f32.vlgmr.msrb.gmra.mxu1 %v278_v39 }
 0x116   :  { %v249_v40 = vpop.f32.mrf.mxu2 }
 0x117   :  { %v250_v41 = vadd.f32 %v424_v35, %v249_v40 }
 0x119   :  { %v271_v42 = vmul.f32 0.01, %v250_v41 }
 0x11b   :  { %v279_v43 = vmax.f32 %v250_v41, %v271_v42 }
 0x11d   :  { %325 = vmatmul.f32.vlgmr.msra.gmra.mxu3 %v279_v43 }
 0x11e   :  { %v252_v44 = vpop.f32.mrf.mxu2 }
 0x11f   :  { %v253_v45 = vadd.f32 %v424_v35, %v252_v44 }
 0x121   :  { %v272_v46 = vmul.f32 0.01, %v253_v45 }
 0x123   :  { %v280_v47 = vmax.f32 %v253_v45, %v272_v46 }
 0x125   :  { %328 = vmatmul.f32.gmra.mxu3 %v280_v47 }
 0x126   :  { %v255_v48 = vpop.f32.mrf.mxu2 }
 0x127   :  { %v256_v49 = vadd.f32 %v424_v35, %v255_v48 }
 0x129   :  { %v273_v50 = vmul.f32 0.01, %v256_v49 }
 0x12b   :  { %v281_v51 = vmax.f32 %v256_v49, %v273_v50 }
 0x12d   :  { %331 = vmatmul.f32.gmra.mxu3 %v281_v51 }
 0x12e   :  { %v258_v52 = vpop.f32.mrf.mxu2 }
 0x12f   :  { %v259_v53 = vadd.f32 %v424_v35, %v258_v52 }
 0x131   :  { %v274_v54 = vmul.f32 0.01, %v259_v53 }
 0x133   :  { %v282_v55 = vmax.f32 %v259_v53, %v274_v54 }
 0x135   :  { %334 = vmatmul.f32.gmra.mxu3 %v282_v55 }
 0x136   :  { %v261_v56 = vpop.f32.mrf.mxu2 }
 0x137   :  { %v262_v57 = vadd.f32 %v424_v35, %v261_v56 }
 0x139   :  { %v275_v58 = vmul.f32 0.01, %v262_v57 }
 0x13b   :  { %v283_v59 = vmax.f32 %v262_v57, %v275_v58 }
 0x13d   :  { %337 = vmatmul.f32.gmra.mxu3 %v283_v59 }
 0x13e   :  { %v264_v60 = vpop.f32.mrf.mxu2 }
 0x13f   :  { %v265_v61 = vadd.f32 %v424_v35, %v264_v60 }
 0x141   :  { %v276_v62 = vmul.f32 0.01, %v265_v61 }
 0x143   :  { %v284_v63 = vmax.f32 %v265_v61, %v276_v62 }
 0x145   :  { %340 = vmatmul.f32.gmra.mxu3 %v284_v63 }
 0x146   :  { %v267_v0 = vpop.f32.mrf.mxu2 }
 0x147   :  { %v268_v1 = vadd.f32 %v424_v35, %v267_v0 }
 0x149   :  { %v277_v2 = vmul.f32 0.01, %v268_v1 }
 0x14b   :  { %v285_v3 = vmax.f32 %v268_v1, %v277_v2 }
 0x14d   :  { %343 = vmatmul.f32.gmra.mxu3 %v285_v3 }
 0x18c   :  { %v323_v5 = vpop.f32.mrf.mxu1 }
 0x18d   :  { %v324_v6 = vadd.f32 %v425_v4, %v323_v5 }
 0x18f   :  { %v347_v7 = vmul.f32 0.01, %v324_v6 }
 0x191   :  { %v355_v8 = vmax.f32 %v324_v6, %v347_v7 }
 0x193   :  { %363 = vst [vmem:[%s694_s9] sm:$0xff] %v355_v8 }
 0x1a0   :  { %v326_v9 = vpop.f32.mrf.mxu3 }
 0x1a1   :  { %v327_v10 = vadd.f32 %v425_v4, %v326_v9 }
 0x1a3   :  { %v348_v11 = vmul.f32 0.01, %v327_v10 }
 0x1a5   :  { %v356_v12 = vmax.f32 %v327_v10, %v348_v11 }
 0x1a7   :  { %364 = vst [vmem:[%s694_s9 + $0x8] sm:$0xff] %v356_v12 }
 0x1a8   :  { %v329_v13 = vpop.f32.mrf.mxu3 }
 0x1a9   :  { %v330_v14 = vadd.f32 %v425_v4, %v329_v13 }
 0x1ab   :  { %v349_v15 = vmul.f32 0.01, %v330_v14 }
 0x1ad   :  { %v357_v16 = vmax.f32 %v330_v14, %v349_v15 }
 0x1af   :  { %365 = vst [vmem:[%s694_s9 + $0x10] sm:$0xff] %v357_v16 }
 0x1b0   :  { %v332_v17 = vpop.f32.mrf.mxu3 }
 0x1b1   :  { %v333_v18 = vadd.f32 %v425_v4, %v332_v17 }
 0x1b3   :  { %v350_v19 = vmul.f32 0.01, %v333_v18 }
 0x1b5   :  { %v358_v20 = vmax.f32 %v333_v18, %v350_v19 }
 0x1b7   :  { %366 = vst [vmem:[%s694_s9 + $0x18] sm:$0xff] %v358_v20 }
 0x1b8   :  { %v335_v21 = vpop.f32.mrf.mxu3 }
 0x1b9   :  { %v336_v22 = vadd.f32 %v425_v4, %v335_v21 }
 0x1bb   :  { %v351_v23 = vmul.f32 0.01, %v336_v22 }
 0x1bd   :  { %v359_v24 = vmax.f32 %v336_v22, %v351_v23 }
 0x1bf   :  { %367 = vst [vmem:[%s694_s9 + $0x20] sm:$0xff] %v359_v24 }
 0x1c0   :  { %v338_v25 = vpop.f32.mrf.mxu3 }
 0x1c1   :  { %v339_v26 = vadd.f32 %v425_v4, %v338_v25 }
 0x1c3   :  { %v352_v27 = vmul.f32 0.01, %v339_v26 }
 0x1c5   :  { %v360_v28 = vmax.f32 %v339_v26, %v352_v27 }
 0x1c7   :  { %368 = vst [vmem:[%s694_s9 + $0x28] sm:$0xff] %v360_v28 }
 0x1c8   :  { %v341_v29 = vpop.f32.mrf.mxu3 }
 0x1c9   :  { %v342_v30 = vadd.f32 %v425_v4, %v341_v29 }
 0x1cb   :  { %v353_v31 = vmul.f32 0.01, %v342_v30 }
 0x1cd   :  { %v361_v32 = vmax.f32 %v342_v30, %v353_v31 }
 0x1cf   :  { %369 = vst [vmem:[%s694_s9 + $0x30] sm:$0xff] %v361_v32 }
 0x1d0   :  { %v344_v33 = vpop.f32.mrf.mxu3 }
 0x1d1   :  { %v345_v34 = vadd.f32 %v425_v4, %v344_v33 }
 0x1d3   :  { %v354_v35 = vmul.f32 0.01, %v345_v34 }
 0x1d5   :  { %v362_v36 = vmax.f32 %v345_v34, %v354_v35 }
 0x1d7   :  { %370 = vst [vmem:[%s694_s9 + $0x38] sm:$0xff] %v362_v36 }

</bundles_post_ra>
